<compile_context>
chip_gen: v6e
topology: v6e:2x2x1
jax: 0.10.0
libtpu: 0.0.40
codegen_flags: <defaults>
</compile_context>

<pallas_src>
import math

import jax
import jax.numpy as jnp
from jax.experimental import pallas as pl
from jax.experimental.pallas import tpu as pltpu

SHIFT = math.log(2.0)          # matches torch.log(torch.tensor(2.0)).item()
SOFTPLUS_THRESHOLD = 20.0      # PyTorch F.softplus default threshold

_LANE_WIDTHS = (2048, 1024, 512, 256, 128)   # lane-dense slab widths to try


def _shifted_softplus_kernel(x_ref, o_ref):
    xf = x_ref[...].astype(jnp.float32)
    # Numerically-stable thresholded softplus (PyTorch semantics):
    #   x > 20 -> x ; else -> log1p(exp(x))
    safe_x = jnp.minimum(xf, SOFTPLUS_THRESHOLD)       # avoid exp overflow
    sp = jnp.where(xf > SOFTPLUS_THRESHOLD, xf, jnp.log1p(jnp.exp(safe_x)))
    o_ref[...] = (sp - SHIFT).astype(o_ref.dtype)


def _shifted_softplus_jnp(x):
    """Pure-jnp reference / fallback (identical math, keeps f64 if given)."""
    cdt = jnp.promote_types(x.dtype, jnp.float32)
    xf = x.astype(cdt)
    sp = jnp.where(xf > SOFTPLUS_THRESHOLD, xf,
                   jnp.log1p(jnp.exp(jnp.minimum(xf, SOFTPLUS_THRESHOLD))))
    return (sp - SHIFT).astype(x.dtype)


def _sublane_tile(itemsize):
    """Packed sublane tile for the dtype: f32 -> 8, bf16 -> 16, int8/fp8 -> 32."""
    return max(8, 32 // max(1, itemsize))


def _chip_profile():
    """(tensorcores_per_chip, target_block_bytes) from the local device kind.

    Conservative defaults (1 TC, 2 MiB blocks) when detection fails, which is
    always safe: 2 MiB in + 2 MiB out, each double-buffered = 8 MiB scoped
    VMEM, inside every generation's default budget.
    """
    try:
        kind = jax.devices()[0].device_kind.lower()
    except Exception:  # no devices / not TPU — fallback path will be used anyway
        return 1, 2 * 1024 * 1024
    if "v7" in kind or "tpu7" in kind:
        return 2, 4 * 1024 * 1024      # 2 TCs; 16 MiB footprint < 32 MiB scoped
    if "v6" in kind:
        return 1, 4 * 1024 * 1024      # 16 MiB footprint < 32 MiB scoped
    return 1, 2 * 1024 * 1024          # v5e & older: 8 MiB < 16 MiB scoped


def _choose_slab(n, itemsize, num_cores, target_block_bytes):
    """Zero-copy (rows, width, block_rows) factorization; width % 128 == 0."""
    tile = _sublane_tile(itemsize)

    width = None
    # Prefer widths whose row count is a whole number of packed sublane tiles.
    for w in _LANE_WIDTHS:
        if n % w == 0 and (n // w) >= tile and (n // w) % tile == 0:
            width = w
            break
    if width is None:
        for w in _LANE_WIDTHS:
            if n % w == 0 and (n // w) >= tile:
                width = w
                break
    if width is None:
        for w in _LANE_WIDTHS:          # n % 128 == 0 guarantees a hit at 128
            if n % w == 0:
                width = w
                break
    rows = n // width

    if rows <= tile:
        return rows, width, rows        # single full-array block, grid=(1,)

    bytes_per_row = width * itemsize
    block_rows = min(rows, max(1, target_block_bytes // bytes_per_row))
    block_rows = max(tile, (block_rows // tile) * tile)

    # Only chips with 2 TensorCores benefit from a forced multi-step grid:
    # aim for >= 4 steps (2 per core) so a ragged tail still load-balances.
    if num_cores >= 2:
        per_step = ((rows // (2 * num_cores)) // tile) * tile
        if per_step >= tile:
            block_rows = min(block_rows, per_step)

    # Short grids: prefer a block_rows that divides rows exactly so the last
    # block is not a masked/padded partial store.
    steps = -(-rows // block_rows)
    if steps <= 8 and rows % block_rows != 0:
        for cand in range(block_rows, tile - 1, -tile):
            if rows % cand == 0:
                block_rows = cand
                break

    return rows, width, block_rows


def shifted_softplus(x, *, min_pallas_bytes=1 << 20):
    """ShiftedSoftplus applied elementwise.

    Large inputs whose element count is a multiple of 128 are reshaped
    (zero-copy: no pad, no tail slice, no extra HBM traffic) into a lane-dense
    (rows, width) slab and streamed through a Pallas kernel in 2-4 MiB blocks
    (chip-dependent).  Small / ragged / float64 inputs use the fused jnp
    expression, which is strictly better there.
    """
    n = x.size
    itemsize = jnp.dtype(x.dtype).itemsize
    if (n == 0 or n % 128 != 0 or n * itemsize < min_pallas_bytes
            or x.dtype == jnp.float64):
        return _shifted_softplus_jnp(x)

    num_cores, target_block_bytes = _chip_profile()
    rows, width, block_rows = _choose_slab(n, itemsize, num_cores,
                                           target_block_bytes)
    x2d = x.reshape(rows, width)           # zero-copy factorization
    grid = (pl.cdiv(rows, block_rows),)

    out2d = pl.pallas_call(
        _shifted_softplus_kernel,
        out_shape=jax.ShapeDtypeStruct((rows, width), x.dtype),
        grid_spec=pl.GridSpec(
            grid=grid,
            in_specs=[pl.BlockSpec((block_rows, width), lambda i: (i, 0))],
            out_specs=pl.BlockSpec((block_rows, width), lambda i: (i, 0)),
        ),
        compiler_params=pltpu.CompilerParams(
            dimension_semantics=("parallel",)),
    )(x2d)

    return out2d.reshape(x.shape)


if __name__ == "__main__":
    key = jax.random.PRNGKey(0)
    k1, k2, k3 = jax.random.split(key, 3)

    # Demo shape consistent with conv-style activations: (N, C, H, W).
    x_small = jax.random.normal(k1, (2, 4, 16, 16), dtype=jnp.float32) * 5.0
    # Force the Pallas path (the default size threshold would route this tiny
    # tensor to the jnp fallback) so the kernel is exercised.
    out_small = jax.block_until_ready(
        shifted_softplus(x_small, min_pallas_bytes=0))
    ref_small = _shifted_softplus_jnp(x_small)
    assert out_small.shape == x_small.shape and out_small.dtype == x_small.dtype
    assert jnp.allclose(out_small, ref_small, atol=1e-5, rtol=1e-5)

    # bf16 input: exercises the 16-row packed-sublane tile path.
    x_bf16 = (jax.random.normal(k2, (8, 16, 128), dtype=jnp.float32) * 5.0
              ).astype(jnp.bfloat16)
    out_bf16 = jax.block_until_ready(
        shifted_softplus(x_bf16, min_pallas_bytes=0))
    ref_bf16 = _shifted_softplus_jnp(x_bf16)
    assert out_bf16.dtype == jnp.bfloat16
    assert jnp.allclose(out_bf16.astype(jnp.float32),
                        ref_bf16.astype(jnp.float32), atol=1e-2, rtol=1e-2)

    # A modest multi-block case to exercise the tiled grid:
    # (4, 16, 64, 128) f32 -> slab (256, 2048); single 2 MiB block on 1-TC
    # chips, 4 x 512 KiB parallel steps on the 2-TC chip.
    x_big = jax.random.normal(k3, (4, 16, 64, 128), dtype=jnp.float32) * 5.0
    out_big = jax.block_until_ready(
        shifted_softplus(x_big, min_pallas_bytes=0))
    ref_big = _shifted_softplus_jnp(x_big)
    assert jnp.allclose(out_big, ref_big, atol=1e-5, rtol=1e-5)

    print("KERNEL_OK")
</pallas_src>

<mosaic_0001>
module attributes {stable_mosaic.version = 11 : i64} {
  func.func @_shifted_softplus_kernel(%arg0: i32, %arg1: memref<8x256xf32, #tpu.memory_space<vmem>>, %arg2: memref<8x256xf32, #tpu.memory_space<vmem>>) attributes {dimension_semantics = [#tpu.dimension_semantics<parallel>], iteration_bounds = array<i64: 1>, scalar_prefetch = 0 : i64, scratch_operands = 0 : i64, tpu.core_type = #tpu.core_type<tc>, window_params = [{transform_indices = @transform_0, window_bounds = array<i64: 8, 256>}, {transform_indices = @transform_1, window_bounds = array<i64: 8, 256>}]} {
    %c0 = arith.constant 0 : index
    %c0_0 = arith.constant 0 : index
    %0 = vector.load %arg1[%c0, %c0_0] : memref<8x256xf32, #tpu.memory_space<vmem>>, vector<8x256xf32>
    %cst = arith.constant 2.000000e+01 : f32
    %1 = vector.broadcast %cst : f32 to vector<8x256xf32>
    %2 = arith.minimumf %0, %1 : vector<8x256xf32>
    %cst_1 = arith.constant 2.000000e+01 : f32
    %3 = vector.broadcast %cst_1 : f32 to vector<8x256xf32>
    %4 = arith.cmpf ogt, %0, %3 : vector<8x256xf32>
    %5 = math.exp %2 : vector<8x256xf32>
    %6 = math.log1p %5 : vector<8x256xf32>
    %7 = arith.select %4, %0, %6 : vector<8x256xi1>, vector<8x256xf32>
    %cst_2 = arith.constant 0.693147182 : f32
    %8 = vector.broadcast %cst_2 : f32 to vector<8x256xf32>
    %9 = arith.subf %7, %8 : vector<8x256xf32>
    %c0_3 = arith.constant 0 : index
    %c0_4 = arith.constant 0 : index
    %10 = vector.load %arg2[%c0_3, %c0_4] : memref<8x256xf32, #tpu.memory_space<vmem>>, vector<8x256xf32>
    tpu.vector_store %arg2[%c0_3, %c0_4], %9 {strides = array<i32>} : memref<8x256xf32, #tpu.memory_space<vmem>>, vector<8x256xf32>,
    return
  }
  func.func @transform_0(%arg0: i32) -> (i32, i32) {
    %c0_i32 = arith.constant 0 : i32
    %c0_i32_0 = arith.constant 0 : i32
    return %arg0, %c0_i32 : i32, i32
  }
  func.func @transform_1(%arg0: i32) -> (i32, i32) {
    %c0_i32 = arith.constant 0 : i32
    %c0_i32_0 = arith.constant 0 : i32
    return %arg0, %c0_i32 : i32, i32
  }
}

</mosaic_0001>

<bundles_post_ra>
// kernel: tpu_custom_call.1
= control target key start
LH: loop header
LB: loop body
LE: loop exit
PB: predicated region body
PF: predicated region fallthrough
CT: control target
= control target key end

     0   :  { %6 = vsyncpa [#allocation3], 0  ;;  %s144_s0 = inlined_call_operand.hbm [shape: f32[8,256], index: 0, kind: input, shape index: {}]   ;;  %s145_s1 = inlined_call_operand.hbm [shape: f32[8,256], index: 1, kind: output, shape index: {}]  }
   0x1   :  { %7 = vsyncpa [#allocation4], 0  ;;  %s126_s6 = smov [#allocation2]  }
   0x2   :  { %s14_s7 = sshll.u32 %s126_s6, 4  ;;  %s15_s7 = int_to_ptr.vmem [resolvable:$true] %s14_s7 }
   0x3   :  { %s90_s8 = scalar_lea.vmem %s15_s7, 256  ;;  %p95_p1 = scmp.lt.s32.totalorder %s15_s7, %s15_s7 }
   0x4   :  { %p91_p0 = scmp.ne.s32.totalorder %s15_s7, %s90_s8  ;;  %p96_p2 = scmp.lt.s32.totalorder %s90_s8, %s90_s8 }
   0x6   :  { %p97_p3 = por %p96_p2, %p95_p1 }
   0x8   :  { %p98_p4 = pnand %p97_p3, %p91_p0 }
   0xa   :  { %101 = shalt.err (!%p98_p4)
}
   0xb   :  { %17 = dma.hbm_to_vmem [thread:$0]  %s144_s0, 256, %s15_s7, [#allocation3]  }
   0xc   :  { %122 = dma.done.wait [#allocation3], 256  }
   0xd   :  { %123 = vsyncadd [#allocation3], 4294967040  ;;  %v21_v0 = vld [vmem:[#allocation2] sm:$0xff]  ;;  %v22_v1 = vld [vmem:[#allocation2 + $0x8] sm:$0xff]  ;;  %s127_s0 = smov [#allocation5]  }
   0xe   :  { %v23_v2 = vmin.f32 %v21_v0, 20.0  ;;  %v24_v3 = vmin.f32 %v22_v1, 20.0  ;;  %vm25_vm1 = vcmp.gt.f32.partialorder %v21_v0, 20.0  ;;  %vm26_vm3 = vcmp.gt.f32.partialorder %v22_v1, 20.0  ;;  %s61_s11 = sshll.u32 %s127_s0, 4  ;;  %s62_s11 = int_to_ptr.vmem [resolvable:$true] %s61_s11 }
   0xf   :  { %s102_s12 = scalar_lea.vmem %s62_s11, 256  ;;  %p107_p6 = scmp.lt.s32.totalorder %s62_s11, %s62_s11 }
  0x10   :  { %v27_v4 = vmul.f32 1.442695, %v23_v2  ;;  %v29_v5 = vmul.f32 1.442695, %v24_v3  ;;  %p103_p5 = scmp.ne.s32.totalorder %s62_s11, %s102_s12  ;;  %p108_p7 = scmp.lt.s32.totalorder %s102_s12, %s102_s12 }
  0x12   :  { %74 = vpow2.f32 %v27_v4  ;;  %p109_p8 = por %p108_p7, %p107_p6 }
  0x13   :  { %76 = vpow2.f32 %v29_v5 }
  0x14   :  { %p110_p9 = pnand %p109_p8, %p103_p5 }
  0x1f   :  { %v75_v6 = vpop.eup %74 }
  0x20   :  { %v77_v7 = vpop.eup %76  ;;  %v31_v8 = vadd.f32 1.0, %v75_v6  ;;  %v34_v10 = vmul.f32 -0.5, %v75_v6  ;;  %v37_v13 = vand.u32 2147483647, %v75_v6 }
  0x21   :  { %v40_v9 = vadd.f32 1.0, %v77_v7  ;;  %v43_v11 = vmul.f32 -0.5, %v77_v7  ;;  %v46_v15 = vand.u32 2147483647, %v77_v7 }
  0x22   :  { %78 = vlog2.f32 %v31_v8  ;;  %v35_v12 = vadd.f32 1.0, %v34_v10  ;;  %vm38_vm0 = vcmp.lt.f32.partialorder %v37_v13, 0.0004427343 }
  0x23   :  { %80 = vlog2.f32 %v40_v9  ;;  %v44_v14 = vadd.f32 1.0, %v43_v11  ;;  %vm47_vm2 = vcmp.lt.f32.partialorder %v46_v15, 0.0004427343 }
  0x24   :  { %v36_v16 = vmul.f32 %v75_v6, %v35_v12 }
  0x25   :  { %v45_v18 = vmul.f32 %v77_v7, %v44_v14 }
  0x2f   :  { %v79_v17 = vpop.eup %78 }
  0x30   :  { %v81_v19 = vpop.eup %80  ;;  %v33_v20 = vmul.f32 0.6931472, %v79_v17 }
  0x31   :  { %v42_v21 = vmul.f32 0.6931472, %v81_v19 }
  0x32   :  { %v39_v22 = vsel %vm38_vm0, %v36_v16, %v33_v20 }
  0x33   :  { %v49_v23 = vsel %vm25_vm1, %v21_v0, %v39_v22  ;;  %v48_v24 = vsel %vm47_vm2, %v45_v18, %v42_v21 }
  0x34   :  { %v70_v25 = vadd.f32 -0.6931472, %v49_v23  ;;  %v50_v26 = vsel %vm26_vm3, %v22_v1, %v48_v24 }
  0x35   :  { %v71_v27 = vadd.f32 -0.6931472, %v50_v26 }
  0x36   :  { %53 = vst [vmem:[#allocation5] sm:$0xff] %v70_v25 }
  0x37   :  { %54 = vst [vmem:[#allocation5 + $0x8] sm:$0xff] %v71_v27 }
  0x38   :  { %113 = shalt.err (!%p110_p9)
}
  0x39   :  { %64 = dma.vmem_to_hbm [thread:$0]  %s62_s11, 256, %s145_s1, [#allocation4]  }
  0x3a   :  { %124 = dma.done.wait [#allocation4], 256  }
  0x3b   :  { %125 = vsyncadd [#allocation4], 4294967040 }
  0x3c   :  { %68 = vsyncpa [#allocation3], 1 }
  0x3d   :  { %69 = vsyncpa [#allocation4], 1 }

</bundles_post_ra>
